<compile_context>
chip_gen: v5e
topology: v5e:2x2
jax: 0.10.0
libtpu: 0.0.40
codegen_flags: <defaults>
</compile_context>

<pallas_src>
import functools

import jax
import jax.numpy as jnp
from jax import lax
from jax.experimental import pallas as pl
from jax.experimental.pallas import tpu as pltpu


# ----------------------------------------------------------------------------
# Small helpers
# ----------------------------------------------------------------------------
def _round_up(x: int, m: int) -> int:
    return (x + m - 1) // m * m


def _tpu_budget_and_tm_cap():
    """Per-generation scoped-VMEM budget and M-tile cap."""
    try:
        kind = jax.devices()[0].device_kind.lower()
    except Exception:  # pragma: no cover - no device info available
        kind = ""
    if "v5" in kind or "v6" in kind:
        # 128 MiB physical VMEM: generous budget, larger row tiles pay off.
        return 96 * 1024 * 1024, 512
    # v7x (64 MiB physical) and anything unrecognised: stay conservative.
    return 48 * 1024 * 1024, 256


def _choose_tm(m_rows: int, tm_cap: int) -> int:
    """Pick the M row-tile: aim for >= 4 grid steps (>= 2 per TensorCore on
    v7x) so the patch-tile DMA hides behind the previous tile's matmul."""
    tm = max(8, _round_up(pl.cdiv(m_rows, 4), 8))
    return min(tm, tm_cap)


def _working_set_bytes(tm, tk, cp, emit_relu, n_k):
    """Conservative per-step resident VMEM (double-buffered pipelining)."""
    patch = 2 * tm * tk * 2                     # bf16 patch tile, x2 buffers
    weight = 2 * tk * cp * 2                    # bf16 weight tile (worst case x2)
    bias = 2 * cp * 4
    out = 2 * tm * cp * 4                       # f32 output tile, x2 buffers
    out_relu = (2 * tm * cp * 2) if emit_relu else 0
    acc = tm * cp * 4                           # f32 accumulator scratch
    return patch + weight + bias + out + out_relu + acc


def _choose_k_tiling(kp, tm, cp, emit_relu, budget):
    """Split Kp (multiple of 128) into n_k equal, 128-aligned K tiles such
    that the working set fits the VMEM budget; prefer a single K step."""
    n_units = kp // 128
    for n_k in range(1, n_units + 1):
        if n_units % n_k:
            continue
        tk = (n_units // n_k) * 128
        if _working_set_bytes(tm, tk, cp, emit_relu, n_k) <= budget:
            return tk, n_k
    return 128, n_units


# ----------------------------------------------------------------------------
# Pallas kernel: K-tiled matmul with f32 accumulator + bias epilogue.
# Optionally emits a second bf16 relu(out) output (feeds the next conv).
# ----------------------------------------------------------------------------
def _matmul_bias_kernel(x_ref, w_ref, b_ref, *refs, emit_relu: bool):
    # x_ref: (TM, TK) bf16 im2col patch tile
    # w_ref: (TK, Cp) bf16 weight tile (taps folded into K)
    # b_ref: (1, Cp)  f32 bias
    # o_ref: (TM, Cp) f32 output tile; o_relu_ref: (TM, Cp) bf16 (optional)
    if emit_relu:
        o_ref, o_relu_ref, acc_ref = refs
    else:
        o_ref, acc_ref = refs
        o_relu_ref = None

    k = pl.program_id(1)

    @pl.when(k == 0)
    def _init():
        acc_ref[...] = jnp.zeros_like(acc_ref)

    acc_ref[...] += jnp.dot(x_ref[...], w_ref[...],
                            preferred_element_type=jnp.float32)   # MXU

    @pl.when(k == pl.num_programs(1) - 1)
    def _finalize():
        y = acc_ref[...] + b_ref[...]
        o_ref[...] = y.astype(o_ref.dtype)
        if emit_relu:
            # ReLU computed ONCE on the f32 accumulator (not on bf16 patches).
            o_relu_ref[...] = jnp.maximum(y, 0.0).astype(o_relu_ref.dtype)


# ----------------------------------------------------------------------------
# 3x3, stride-2, pad-1 conv: bf16 im2col in the wrapper, MXU matmul in Pallas.
# ----------------------------------------------------------------------------
def conv3x3_s2(x_nhwc, w_mat, b_mat, cout, *, emit_relu=False):
    """x_nhwc: (N,H,W,Cin) f32 or bf16; w_mat: (Kp, Cp) bf16 pre-laid-out
    weights; b_mat: (1, Cp) f32 bias.  Returns f32 (N,Ho,Wo,cout) and, when
    emit_relu, also bf16 relu of it (for feeding the next conv's im2col)."""
    N, H, W, Cin = x_nhwc.shape
    Kp, Cp = w_mat.shape
    K = 9 * Cin
    assert Kp == _round_up(K, 128) and Cp % 128 == 0 and Cp >= cout
    Ho = (H + 2 - 3) // 2 + 1
    Wo = (W + 2 - 3) // 2 + 1

    # --- im2col in bf16 (halves the HBM traffic of the 2.25x patch slab) ---
    # No-op cast when the input already arrives in bf16 (p6 -> p7 hand-off).
    x_pad = jnp.pad(x_nhwc.astype(jnp.bfloat16), ((0, 0), (1, 1), (1, 1), (0, 0)))
    taps = []
    for kh in range(3):
        for kw in range(3):
            taps.append(
                lax.slice(
                    x_pad,
                    (0, kh, kw, 0),
                    (N, kh + 2 * Ho - 1, kw + 2 * Wo - 1, Cin),
                    (1, 2, 2, 1),
                )
            )
    patches = jnp.concatenate(taps, axis=-1).reshape(N * Ho * Wo, K)

    M = patches.shape[0]
    budget, tm_cap = _tpu_budget_and_tm_cap()
    TM = _choose_tm(M, tm_cap)
    Mp = _round_up(M, TM)
    TK, n_k = _choose_k_tiling(Kp, TM, Cp, emit_relu, budget)
    ws = _working_set_bytes(TM, TK, Cp, emit_relu, n_k)
    vmem_limit = int(min(budget, max(2 * ws, 32 * 1024 * 1024)))

    patches = jnp.pad(patches, ((0, Mp - M), (0, Kp - K)))   # already bf16

    kernel = functools.partial(_matmul_bias_kernel, emit_relu=emit_relu)
    if emit_relu:
        out_shape = (jax.ShapeDtypeStruct((Mp, Cp), jnp.float32),
                     jax.ShapeDtypeStruct((Mp, Cp), jnp.bfloat16))
        out_specs = (pl.BlockSpec((TM, Cp), lambda i, k: (i, 0)),
                     pl.BlockSpec((TM, Cp), lambda i, k: (i, 0)))
    else:
        out_shape = jax.ShapeDtypeStruct((Mp, Cp), jnp.float32)
        out_specs = pl.BlockSpec((TM, Cp), lambda i, k: (i, 0))

    def run(single_buffer_consts: bool):
        # Grid-constant operands (full-K weight, bias) can be single-buffered:
        # halves their resident VMEM (matters on v7x's 64 MiB).
        if single_buffer_consts and n_k == 1:
            w_spec = pl.BlockSpec((TK, Cp), lambda i, k: (0, 0),
                                  pipeline_mode=pl.Buffered(1))
            b_spec = pl.BlockSpec((1, Cp), lambda i, k: (0, 0),
                                  pipeline_mode=pl.Buffered(1))
        else:
            w_map = (lambda i, k: (0, 0)) if n_k == 1 else (lambda i, k: (k, 0))
            w_spec = pl.BlockSpec((TK, Cp), w_map)
            b_spec = pl.BlockSpec((1, Cp), lambda i, k: (0, 0))
        return pl.pallas_call(
            kernel,
            out_shape=out_shape,
            grid_spec=pltpu.PrefetchScalarGridSpec(
                num_scalar_prefetch=0,
                grid=(Mp // TM, n_k),
                in_specs=[
                    pl.BlockSpec((TM, TK), lambda i, k: (i, k)),   # patch tile
                    w_spec,                                        # weight
                    b_spec,                                        # bias
                ],
                out_specs=out_specs,
                scratch_shapes=[pltpu.VMEM((TM, Cp), jnp.float32)],
            ),
            compiler_params=pltpu.CompilerParams(
                dimension_semantics=("parallel", "arbitrary"),
                vmem_limit_bytes=vmem_limit,
            ),
        )(patches, w_mat, b_mat)

    if n_k == 1:
        try:
            outs = run(True)
        except Exception:   # older JAX without Buffered(1): default buffering
            outs = run(False)
    else:
        outs = run(False)

    if emit_relu:
        out, out_relu = outs
        out = out[:M, :cout].reshape(N, Ho, Wo, cout)
        out_relu = out_relu[:M, :cout].reshape(N, Ho, Wo, cout)
        return out, out_relu
    return outs[:M, :cout].reshape(N, Ho, Wo, cout)


# ----------------------------------------------------------------------------
# XLA fallback for tiny channel counts (Cout < 128 wastes >90% of the padded
# MXU columns / store bandwidth, so production small-channel configs should
# not take the Pallas path).
# ----------------------------------------------------------------------------
def _xla_conv3x3_s2(x_nhwc, w_oihw, b):
    out = lax.conv_general_dilated(
        x_nhwc, w_oihw, window_strides=(2, 2), padding=((1, 1), (1, 1)),
        dimension_numbers=("NHWC", "OIHW", "NHWC"))
    return out + b.reshape(1, 1, 1, -1)


# ----------------------------------------------------------------------------
# Module: LastLevelP6P7 (forward only)
# ----------------------------------------------------------------------------
def _kaiming_uniform(key, shape, a=1.0):
    # shape = (Cout, Cin, kh, kw); fan_in = Cin * kh * kw
    fan_in = shape[1] * shape[2] * shape[3]
    gain = (2.0 / (1.0 + a * a)) ** 0.5
    bound = gain * (3.0 / fan_in) ** 0.5
    return jax.random.uniform(key, shape, jnp.float32, -bound, bound)


def _prep_conv_weights(weight_oihw, bias):
    """OIHW -> (9*Cin, Cout) tap-major matrix, padded to (Kp, Cp), bf16.
    Done once at init so every forward skips the layout/cast HBM passes."""
    cout, cin = weight_oihw.shape[0], weight_oihw.shape[1]
    K = 9 * cin
    Kp = _round_up(K, 128)
    Cp = _round_up(cout, 128)
    w_mat = jnp.transpose(weight_oihw, (2, 3, 1, 0)).reshape(K, cout)
    w_mat = jnp.pad(w_mat, ((0, Kp - K), (0, Cp - cout))).astype(jnp.bfloat16)
    b_mat = jnp.pad(bias.astype(jnp.float32).reshape(1, cout),
                    ((0, 0), (0, Cp - cout)))
    return w_mat, b_mat


class LastLevelP6P7:
    """JAX/Pallas port of the PyTorch LastLevelP6P7 module (forward only)."""

    def __init__(self, in_channels, out_channels, key, *, force_pallas=False):
        k6, k7 = jax.random.split(key)
        self.out_channels = out_channels
        self.p6_w = _kaiming_uniform(k6, (out_channels, in_channels, 3, 3), a=1.0)
        self.p6_b = jnp.zeros((out_channels,), jnp.float32)
        self.p7_w = _kaiming_uniform(k7, (out_channels, out_channels, 3, 3), a=1.0)
        self.p7_b = jnp.zeros((out_channels,), jnp.float32)
        self.use_P5 = in_channels == out_channels
        # Tiny-channel guard: route Cout < 128 configs through XLA's conv
        # unless explicitly forced onto the Pallas path (as in the demo).
        self.use_pallas = force_pallas or (out_channels >= 128 and 9 * in_channels >= 128)
        # Hoisted, pre-laid-out bf16 weights + padded biases (feedback item).
        self.p6_wmat, self.p6_bmat = _prep_conv_weights(self.p6_w, self.p6_b)
        self.p7_wmat, self.p7_bmat = _prep_conv_weights(self.p7_w, self.p7_b)

    def __call__(self, c5, p5):
        # c5, p5: NCHW (PyTorch convention)
        x = p5 if self.use_P5 else c5
        x_nhwc = jnp.transpose(x, (0, 2, 3, 1))
        if self.use_pallas:
            # p6 kernel also emits relu(p6) in bf16; p7's im2col consumes it
            # directly (no relu on patch tiles, no extra f32->bf16 HBM pass).
            p6, p6_relu_bf16 = conv3x3_s2(x_nhwc, self.p6_wmat, self.p6_bmat,
                                          self.out_channels, emit_relu=True)
            p7 = conv3x3_s2(p6_relu_bf16, self.p7_wmat, self.p7_bmat,
                            self.out_channels, emit_relu=False)
        else:
            # TODO(synk): small-channel configs could instead batch several
            # outputs into one lane-dense slab; XLA conv fallback for now.
            p6 = _xla_conv3x3_s2(x_nhwc, self.p6_w, self.p6_b)
            p7 = _xla_conv3x3_s2(jnp.maximum(p6, 0.0), self.p7_w, self.p7_b)
        return [jnp.transpose(p6, (0, 3, 1, 2)), jnp.transpose(p7, (0, 3, 1, 2))]


# ----------------------------------------------------------------------------
# Reference (plain JAX, bf16-matched operands) for verification
# ----------------------------------------------------------------------------
def _ref_conv(x_nchw, w_oihw, b):
    xb = x_nchw.astype(jnp.bfloat16).astype(jnp.float32)
    wb = w_oihw.astype(jnp.bfloat16).astype(jnp.float32)
    out = lax.conv_general_dilated(
        xb, wb, window_strides=(2, 2), padding=((1, 1), (1, 1)),
        dimension_numbers=("NCHW", "OIHW", "NCHW"),
    )
    return out + b.reshape(1, -1, 1, 1)


def _ref_forward(module, c5, p5):
    x = p5 if module.use_P5 else c5
    p6 = _ref_conv(x, module.p6_w, module.p6_b)
    p7 = _ref_conv(jnp.maximum(p6, 0.0), module.p7_w, module.p7_b)
    return [p6, p7]


if __name__ == "__main__":
    key = jax.random.PRNGKey(0)
    k_c5, k_p5, k_params = jax.random.split(key, 3)

    in_channels, out_channels = 4, 8
    c5 = jax.random.normal(k_c5, (2, in_channels, 16, 16), jnp.float32)
    p5 = jax.random.normal(k_p5, (2, out_channels, 16, 16), jnp.float32)

    # force_pallas=True so the toy channel counts exercise the Pallas kernel
    # (production Cout=256 takes the Pallas path automatically).
    module = LastLevelP6P7(in_channels, out_channels, k_params, force_pallas=True)

    p6, p7 = module(c5, p5)
    jax.block_until_ready(p6)
    jax.block_until_ready(p7)

    assert p6.shape == (2, out_channels, 8, 8), p6.shape
    assert p7.shape == (2, out_channels, 4, 4), p7.shape

    # Verify against a plain-JAX conv reference using the same bf16 MXU
    # operand precision (f32 accumulation).
    p6_ref, p7_ref = _ref_forward(module, c5, p5)
    assert jnp.allclose(p6, p6_ref, atol=2e-2, rtol=2e-2), \
        float(jnp.max(jnp.abs(p6 - p6_ref)))
    assert jnp.allclose(p7, p7_ref, atol=2e-2, rtol=2e-2), \
        float(jnp.max(jnp.abs(p7 - p7_ref)))

    print("KERNEL_OK")
</pallas_src>

<mosaic_0001>
module attributes {stable_mosaic.version = 11 : i64} {
  func.func @_matmul_bias_kernel(%arg0: i32, %arg1: i32, %arg2: memref<32x128xbf16, #tpu.memory_space<vmem>>, %arg3: memref<128x128xbf16, #tpu.memory_space<vmem>>, %arg4: memref<1x128xf32, #tpu.memory_space<vmem>>, %arg5: memref<32x128xf32, #tpu.memory_space<vmem>>, %arg6: memref<32x128xbf16, #tpu.memory_space<vmem>>, %arg7: memref<32x128xf32, #tpu.memory_space<vmem>>) attributes {dimension_semantics = [#tpu.dimension_semantics<parallel>, #tpu.dimension_semantics<arbitrary>], iteration_bounds = array<i64: 4, 1>, scalar_prefetch = 0 : i64, scratch_operands = 1 : i64, tpu.core_type = #tpu.core_type<tc>, window_params = [{transform_indices = @transform_0, window_bounds = array<i64: 32, 128>}, {pipeline_mode = #tpu.pipeline_mode<synchronous>, transform_indices = @transform_1, window_bounds = array<i64: 128, 128>}, {pipeline_mode = #tpu.pipeline_mode<synchronous>, transform_indices = @transform_2, window_bounds = array<i64: 1, 128>}, {transform_indices = @transform_3, window_bounds = array<i64: 32, 128>}, {transform_indices = @transform_4, window_bounds = array<i64: 32, 128>}]} {
    %c0_i32 = arith.constant 0 : i32
    %0 = arith.cmpi eq, %arg1, %c0_i32 : i32
    %1 = arith.extui %0 : i1 to i32
    %c0_i32_0 = arith.constant 0 : i32
    %2 = arith.cmpi ne, %1, %c0_i32_0 : i32
    scf.if %2 {
      %cst_10 = arith.constant 0.000000e+00 : f32
      %12 = vector.broadcast %cst_10 : f32 to vector<32x128xf32>
      %c0_11 = arith.constant 0 : index
      %c0_12 = arith.constant 0 : index
      %13 = vector.load %arg7[%c0_11, %c0_12] : memref<32x128xf32, #tpu.memory_space<vmem>>, vector<32x128xf32>
      tpu.vector_store %arg7[%c0_11, %c0_12], %12 {strides = array<i32>} : memref<32x128xf32, #tpu.memory_space<vmem>>, vector<32x128xf32>,
    } else {
    }
    %c0 = arith.constant 0 : index
    %c0_1 = arith.constant 0 : index
    %3 = vector.load %arg7[%c0, %c0_1] : memref<32x128xf32, #tpu.memory_space<vmem>>, vector<32x128xf32>
    %c0_2 = arith.constant 0 : index
    %c0_3 = arith.constant 0 : index
    %4 = vector.load %arg2[%c0_2, %c0_3] : memref<32x128xbf16, #tpu.memory_space<vmem>>, vector<32x128xbf16>
    %c0_4 = arith.constant 0 : index
    %c0_5 = arith.constant 0 : index
    %5 = vector.load %arg3[%c0_4, %c0_5] : memref<128x128xbf16, #tpu.memory_space<vmem>>, vector<128x128xbf16>
    %cst = arith.constant dense<0.000000e+00> : vector<32x128xf32>
    %6 = tpu.matmul %4, %5, %cst {dimension_numbers = #tpu.dot_dimension_numbers<[1], [0], [0], [1], [0, 0, 1, 1], [], []>} : vector<32x128xbf16>, vector<128x128xbf16>, vector<32x128xf32> -> vector<32x128xf32>
    %7 = arith.addf %3, %6 : vector<32x128xf32>
    %c0_6 = arith.constant 0 : index
    %c0_7 = arith.constant 0 : index
    %8 = vector.load %arg7[%c0_6, %c0_7] : memref<32x128xf32, #tpu.memory_space<vmem>>, vector<32x128xf32>
    tpu.vector_store %arg7[%c0_6, %c0_7], %7 {strides = array<i32>} : memref<32x128xf32, #tpu.memory_space<vmem>>, vector<32x128xf32>,
    %c0_i32_8 = arith.constant 0 : i32
    %9 = arith.cmpi eq, %arg1, %c0_i32_8 : i32
    %10 = arith.extui %9 : i1 to i32
    %c0_i32_9 = arith.constant 0 : i32
    %11 = arith.cmpi ne, %10, %c0_i32_9 : i32
    scf.if %11 {
      %c0_10 = arith.constant 0 : index
      %c0_11 = arith.constant 0 : index
      %12 = vector.load %arg7[%c0_10, %c0_11] : memref<32x128xf32, #tpu.memory_space<vmem>>, vector<32x128xf32>
      %c0_12 = arith.constant 0 : index
      %c0_13 = arith.constant 0 : index
      %13 = vector.load %arg4[%c0_12, %c0_13] : memref<1x128xf32, #tpu.memory_space<vmem>>, vector<1x128xf32>
      %14 = vector.broadcast %13 : vector<1x128xf32> to vector<32x128xf32>
      %15 = arith.addf %12, %14 : vector<32x128xf32>
      %c0_14 = arith.constant 0 : index
      %c0_15 = arith.constant 0 : index
      %16 = vector.load %arg5[%c0_14, %c0_15] : memref<32x128xf32, #tpu.memory_space<vmem>>, vector<32x128xf32>
      tpu.vector_store %arg5[%c0_14, %c0_15], %15 {strides = array<i32>} : memref<32x128xf32, #tpu.memory_space<vmem>>, vector<32x128xf32>,
      %cst_16 = arith.constant 0.000000e+00 : f32
      %17 = vector.broadcast %cst_16 : f32 to vector<32x128xf32>
      %18 = arith.maximumf %15, %17 : vector<32x128xf32>
      %19 = arith.truncf %18 : vector<32x128xf32> to vector<32x128xbf16>
      %c0_17 = arith.constant 0 : index
      %c0_18 = arith.constant 0 : index
      %20 = vector.load %arg6[%c0_17, %c0_18] : memref<32x128xbf16, #tpu.memory_space<vmem>>, vector<32x128xbf16>
      tpu.vector_store %arg6[%c0_17, %c0_18], %19 {strides = array<i32>} : memref<32x128xbf16, #tpu.memory_space<vmem>>, vector<32x128xbf16>,
    } else {
    }
    return
  }
  func.func @transform_0(%arg0: i32, %arg1: i32) -> (i32, i32) {
    %c0_i32 = arith.constant 0 : i32
    return %arg0, %arg1 : i32, i32
  }
  func.func @transform_1(%arg0: i32, %arg1: i32) -> (i32, i32) {
    %c0_i32 = arith.constant 0 : i32
    %c0_i32_0 = arith.constant 0 : i32
    %c0_i32_1 = arith.constant 0 : i32
    return %c0_i32, %c0_i32_0 : i32, i32
  }
  func.func @transform_2(%arg0: i32, %arg1: i32) -> (i32, i32) {
    %c0_i32 = arith.constant 0 : i32
    %c0_i32_0 = arith.constant 0 : i32
    %c0_i32_1 = arith.constant 0 : i32
    return %c0_i32, %c0_i32_0 : i32, i32
  }
  func.func @transform_3(%arg0: i32, %arg1: i32) -> (i32, i32) {
    %c0_i32 = arith.constant 0 : i32
    %c0_i32_0 = arith.constant 0 : i32
    return %arg0, %c0_i32 : i32, i32
  }
  func.func @transform_4(%arg0: i32, %arg1: i32) -> (i32, i32) {
    %c0_i32 = arith.constant 0 : i32
    %c0_i32_0 = arith.constant 0 : i32
    return %arg0, %c0_i32 : i32, i32
  }
}

module attributes {stable_mosaic.version = 11 : i64} {
  func.func @_matmul_bias_kernel(%arg0: i32, %arg1: i32, %arg2: memref<32x128xbf16, #tpu.memory_space<vmem>>, %arg3: memref<128x128xbf16, #tpu.memory_space<vmem>>, %arg4: memref<1x128xf32, #tpu.memory_space<vmem>>, %arg5: memref<32x128xf32, #tpu.memory_space<vmem>>, %arg6: memref<32x128xbf16, #tpu.memory_space<vmem>>, %arg7: memref<32x128xf32, #tpu.memory_space<vmem>>) attributes {dimension_semantics = [#tpu.dimension_semantics<parallel>, #tpu.dimension_semantics<arbitrary>], iteration_bounds = array<i64: 4, 1>, scalar_prefetch = 0 : i64, scratch_operands = 1 : i64, tpu.core_type = #tpu.core_type<tc>, window_params = [{transform_indices = @transform_0, window_bounds = array<i64: 32, 128>}, {pipeline_mode = #tpu.pipeline_mode<synchronous>, transform_indices = @transform_1, window_bounds = array<i64: 128, 128>}, {pipeline_mode = #tpu.pipeline_mode<synchronous>, transform_indices = @transform_2, window_bounds = array<i64: 1, 128>}, {transform_indices = @transform_3, window_bounds = array<i64: 32, 128>}, {transform_indices = @transform_4, window_bounds = array<i64: 32, 128>}]} {
    %c0_i32 = arith.constant 0 : i32
    %0 = arith.cmpi eq, %arg1, %c0_i32 : i32
    %1 = arith.extui %0 : i1 to i32
    %c0_i32_0 = arith.constant 0 : i32
    %2 = arith.cmpi ne, %1, %c0_i32_0 : i32
    scf.if %2 {
      %cst_10 = arith.constant 0.000000e+00 : f32
      %12 = vector.broadcast %cst_10 : f32 to vector<32x128xf32>
      %c0_11 = arith.constant 0 : index
      %c0_12 = arith.constant 0 : index
      %13 = vector.load %arg7[%c0_11, %c0_12] : memref<32x128xf32, #tpu.memory_space<vmem>>, vector<32x128xf32>
      tpu.vector_store %arg7[%c0_11, %c0_12], %12 {strides = array<i32>} : memref<32x128xf32, #tpu.memory_space<vmem>>, vector<32x128xf32>,
    } else {
    }
    %c0 = arith.constant 0 : index
    %c0_1 = arith.constant 0 : index
    %3 = vector.load %arg7[%c0, %c0_1] : memref<32x128xf32, #tpu.memory_space<vmem>>, vector<32x128xf32>
    %c0_2 = arith.constant 0 : index
    %c0_3 = arith.constant 0 : index
    %4 = vector.load %arg2[%c0_2, %c0_3] : memref<32x128xbf16, #tpu.memory_space<vmem>>, vector<32x128xbf16>
    %c0_4 = arith.constant 0 : index
    %c0_5 = arith.constant 0 : index
    %5 = vector.load %arg3[%c0_4, %c0_5] : memref<128x128xbf16, #tpu.memory_space<vmem>>, vector<128x128xbf16>
    %cst = arith.constant dense<0.000000e+00> : vector<32x128xf32>
    %6 = tpu.matmul %4, %5, %cst {dimension_numbers = #tpu.dot_dimension_numbers<[1], [0], [0], [1], [0, 0, 1, 1], [], []>} : vector<32x128xbf16>, vector<128x128xbf16>, vector<32x128xf32> -> vector<32x128xf32>
    %7 = arith.addf %3, %6 : vector<32x128xf32>
    %c0_6 = arith.constant 0 : index
    %c0_7 = arith.constant 0 : index
    %8 = vector.load %arg7[%c0_6, %c0_7] : memref<32x128xf32, #tpu.memory_space<vmem>>, vector<32x128xf32>
    tpu.vector_store %arg7[%c0_6, %c0_7], %7 {strides = array<i32>} : memref<32x128xf32, #tpu.memory_space<vmem>>, vector<32x128xf32>,
    %c0_i32_8 = arith.constant 0 : i32
    %9 = arith.cmpi eq, %arg1, %c0_i32_8 : i32
    %10 = arith.extui %9 : i1 to i32
    %c0_i32_9 = arith.constant 0 : i32
    %11 = arith.cmpi ne, %10, %c0_i32_9 : i32
    scf.if %11 {
      %c0_10 = arith.constant 0 : index
      %c0_11 = arith.constant 0 : index
      %12 = vector.load %arg7[%c0_10, %c0_11] : memref<32x128xf32, #tpu.memory_space<vmem>>, vector<32x128xf32>
      %c0_12 = arith.constant 0 : index
      %c0_13 = arith.constant 0 : index
      %13 = vector.load %arg4[%c0_12, %c0_13] : memref<1x128xf32, #tpu.memory_space<vmem>>, vector<1x128xf32>
      %14 = vector.broadcast %13 : vector<1x128xf32> to vector<32x128xf32>
      %15 = arith.addf %12, %14 : vector<32x128xf32>
      %c0_14 = arith.constant 0 : index
      %c0_15 = arith.constant 0 : index
      %16 = vector.load %arg5[%c0_14, %c0_15] : memref<32x128xf32, #tpu.memory_space<vmem>>, vector<32x128xf32>
      tpu.vector_store %arg5[%c0_14, %c0_15], %15 {strides = array<i32>} : memref<32x128xf32, #tpu.memory_space<vmem>>, vector<32x128xf32>,
      %cst_16 = arith.constant 0.000000e+00 : f32
      %17 = vector.broadcast %cst_16 : f32 to vector<32x128xf32>
      %18 = arith.maximumf %15, %17 : vector<32x128xf32>
      %19 = arith.truncf %18 : vector<32x128xf32> to vector<32x128xbf16>
      %c0_17 = arith.constant 0 : index
      %c0_18 = arith.constant 0 : index
      %20 = vector.load %arg6[%c0_17, %c0_18] : memref<32x128xbf16, #tpu.memory_space<vmem>>, vector<32x128xbf16>
      tpu.vector_store %arg6[%c0_17, %c0_18], %19 {strides = array<i32>} : memref<32x128xbf16, #tpu.memory_space<vmem>>, vector<32x128xbf16>,
    } else {
    }
    return
  }
  func.func @transform_0(%arg0: i32, %arg1: i32) -> (i32, i32) {
    %c0_i32 = arith.constant 0 : i32
    return %arg0, %arg1 : i32, i32
  }
  func.func @transform_1(%arg0: i32, %arg1: i32) -> (i32, i32) {
    %c0_i32 = arith.constant 0 : i32
    %c0_i32_0 = arith.constant 0 : i32
    %c0_i32_1 = arith.constant 0 : i32
    return %c0_i32, %c0_i32_0 : i32, i32
  }
  func.func @transform_2(%arg0: i32, %arg1: i32) -> (i32, i32) {
    %c0_i32 = arith.constant 0 : i32
    %c0_i32_0 = arith.constant 0 : i32
    %c0_i32_1 = arith.constant 0 : i32
    return %c0_i32, %c0_i32_0 : i32, i32
  }
  func.func @transform_3(%arg0: i32, %arg1: i32) -> (i32, i32) {
    %c0_i32 = arith.constant 0 : i32
    %c0_i32_0 = arith.constant 0 : i32
    return %arg0, %c0_i32 : i32, i32
  }
  func.func @transform_4(%arg0: i32, %arg1: i32) -> (i32, i32) {
    %c0_i32 = arith.constant 0 : i32
    %c0_i32_0 = arith.constant 0 : i32
    return %arg0, %c0_i32 : i32, i32
  }
}

</mosaic_0001>

<bundles_post_ra>
// kernel: tpu_custom_call.1
= control target key start
LH: loop header
LB: loop body
LE: loop exit
PB: predicated region body
PF: predicated region fallthrough
CT: control target
= control target key end

     0   :  { %s1162_s0 = inlined_call_operand.hbm [shape: bf16[128,128], index: 0, kind: input, shape index: {}]   ;;  %s1163_s1 = inlined_call_operand.hbm [shape: bf16[128,128], index: 1, kind: input, shape index: {}]   ;;  %s1164_s2 = inlined_call_operand.vmem [shape: f32[1,128], index: 2, kind: input, shape index: {}]   ;;  %s1165_s3 = inlined_call_operand.hbm [shape: f32[128,128], index: 3, kind: output, shape index: {0}]   ;;  %s1166_s4 = inlined_call_operand.hbm [shape: bf16[128,128], index: 4, kind: output, shape index: {1}]  }
   0x1   :  { %1170 = sst [smem:[#allocation16_spill]] %s1163_s1 }
   0x2   :  { %10 = vsyncpa [#allocation4], 0 }
   0x3   :  { %12 = vsyncpa [#allocation4 + $0x1], 0 }
   0x4   :  { %13 = vsyncpa [#allocation7], 0 }
   0x5   :  { %14 = vsyncpa [#allocation5], 0 }
   0x6   :  { %16 = vsyncpa [#allocation5 + $0x1], 0 }
   0x7   :  { %17 = vsyncpa [#allocation10], 0 }
   0x8   :  { %19 = vsyncpa [#allocation10 + $0x1], 0  ;;  %s968_s15 = smov 0   ;;  %s970_s16 = smov 0  }
   0x9   :  { %s972_s17 = smov 0   ;;  %s974_s18 = smov 0  }
   0xa   :  { %s976_s19 = smov 0   ;;  %s978_s20 = smov 0  }
   0xb LB: > { %s578_s21 = sadd.s32 4294967295, %s934_s20   ;;  %s579_s22 = sadd.s32 4294967294, %s934_s20   ;;  %s934_s20 = sphi %s978_s20, %s25_s20   ;;  %s930_s19 = sphi %s976_s19, %s1187_s19   ;;  %s926_s18 = sphi %s974_s18, %s1186_s18   ;;  %s922_s17 = sphi %s972_s17, %s1185_s17   ;;  %s918_s16 = sphi %s970_s16, %s1184_s16   ;;  %s914_s15 = sphi %s968_s15, %s1183_s15  }
   0xc   : > { %p59_p0 = scmp.ne.s32.totalorder %s918_s16, %s914_s15  ;;  %p1002_p1 = scmp.eq.s32.totalorder %s578_s21, 0 }
   0xd   : > { %p1006_p2 = scmp.eq.s32.totalorder %s578_s21, 3  ;;  %p131_p3 = scmp.eq.s32.totalorder %s579_s22, 3 }
   0xe   : > { %p1012_p4 = por %p1002_p1, %p59_p0  ;;  %p580_p5 = scmp.ge.s32.totalorder %s934_s20, 1 }
   0xf   : > { %p1017_p6 = por %p131_p3, %p59_p0  ;;  %p164_p7 = scmp.lt.s32.totalorder %s934_s20, 5 }
  0x10   : > { %s1175_s1 = sld [smem:[#allocation16_spill]]  ;;  %s936_s5 = smov [#allocation6]  }
  0x11   : > { %p1025_p8 = pnand %p580_p5, %p164_p7  ;;  %s177_s6 = sshll.u32 %s936_s5, 4  ;;  %s178_s6 = int_to_ptr.vmem [resolvable:$true] %s177_s6 }
  0x12   : > { %s1167_s7 = smov 64   ;;  %s1168_s8 = smov 4  }
  0x13   : > { %p681_p9 = pneg %p1025_p8  ;;  %s37_s9 = sadd.s32 1, %s930_s19 }
  0x14   : > { %p39_p11 = scmp.ge.s32.totalorder %s37_s9, 4  ;;  %s46_s10 = sadd.s32 1, %s922_s17 }
  0x15   : > { %p682_p10 = pnand %p681_p9, %p1002_p1  ;;  %p53_p12 = scmp.ne.s32.totalorder %s922_s17, %s918_s16 }
  0x16   : > { %s175_s29 = sshll.u32 %s1175_s1, 4  ;;  %p54_p13 = scmp.eq.s32.totalorder %s934_s20, 0  ;;  %s176_s29 = int_to_ptr.hbm [resolvable:$true] %s175_s29 }
  0x17   : > { %684 = dma.hbm_to_vmem [thread:$0]  (!%p682_p10), %s176_s29, 1024, %s178_s6, [#allocation7], %s1167_s7, %s1167_s7, %s1168_s8  }
  0x18   : > { %s1189_s9 = smov (%p39_p11, %s37_s9), 0  ;;  %p1043_p0 = por %p54_p13, %p53_p12 }
  0x19   : > { %1177 = sst [smem:[#allocation15_spill]] %s1189_s9  ;;  %p1049_p3 = por %p1006_p2, %p53_p12 }
  0x1a   : > { %s41_s13 = ssub.s32 %s930_s19, %s1189_s9  ;;  %p697_p5 = scmp.lt.s32.totalorder %s934_s20, 4 }
  0x1b   : > { %p44_p7 = scmp.eq.s32.totalorder %s41_s13, 0  ;;  %s194_s14 = sand.u32 1, %s922_s17  }
  0x1c   : > { %s583_s21 = sshll.u32 %s194_s14, 4  ;;  %s639_s27 = sshll.u32 %s930_s19, 4 }
  0x1d   : > { %s1058_s22 = scalar_select %p44_p7, %s922_s17, %s46_s10  }
  0x1e   : > { %s204_s5 = scalar_lea.hbm %s1162_s0, %s639_s27  ;;  %s198_s6 = scalar_lea.vmem [#allocation3], %s583_s21 }
  0x1f   : > { %s207_s7 = sshll.u32 %s198_s6, 4  ;;  %s205_s24 = sshll.u32 %s204_s5, 4  ;;  %s208_s7 = int_to_ptr.vmem [resolvable:$true] %s207_s7  ;;  %s206_s24 = int_to_ptr.hbm [resolvable:$true] %s205_s24 }
  0x20   : > { %p686_p2 = pnand %p697_p5, %p1043_p0  ;;  %s195_s8 = scalar_lea.sflag [#allocation4], %s194_s14 }
  0x21   : > { %s1180_s1 = smov 4   ;;  %s1181_s9 = smov 64  }
  0x22   : > { %688 = dma.hbm_to_vmem [thread:$0]  (!%p686_p2), %s206_s24, 256, %s208_s7, %s195_s8, %s1181_s9, %s1181_s9, %s1180_s1  }
  0x23   : > { %219 = sbr.rel (%p1025_p8) target bundleno = 230 (0xe6), region = 32  ;;  %s1072_s10 = sand.u32 (!%p1025_p8), 1, %s918_s16  }
  0x24   : > { %s587_s13 = sshll.u32 (!%p1025_p8), %s1072_s10, 4  ;;  %s222_s21 = scalar_lea.sflag (!%p1025_p8), [#allocation4], %s1072_s10 }
  0x25   : > { %s225_s11 = scalar_lea.vmem (!%p1025_p8), [#allocation3], %s587_s13 }
  0x28   : > { %897 = dma.done.wait (%p1012_p4), %s222_s21, 256  }
  0x29   : > { %899 = vsyncadd (%p1012_p4), %s222_s21, 4294967040 }
  0x2a   : > { %901 = dma.done.wait (%p1002_p1), [#allocation7], 1024  }
  0x2b   : > { %903 = vsyncadd (%p1002_p1), [#allocation7], 4294966272  ;;  %v649_v0 = vld [vmem:[#allocation6 + $0x38] sm:$0xff]  ;;  %v648_v1 = vld [vmem:[#allocation6 + $0x30] sm:$0xff]  ;;  %s589_s1 = sshll.u32 %s1072_s10, 5  ;;  %s650_s30 = sshll.u32 %s926_s18, 5 }
  0x2c   : > { %356 = vmatpush.bf16.msra.mxu0 %v649_v0  ;;  %663 = vmatpush.bf16.msra.mxu1 %v649_v0  ;;  %v647_v2 = vld [vmem:[#allocation6 + $0x28] sm:$0xff]  ;;  %v646_v3 = vld [vmem:[#allocation6 + $0x20] sm:$0xff]  ;;  %v645_v4 = vld [vmem:[#allocation6 + $0x18] sm:$0xff]  ;;  %s253_s7 = scalar_lea.vmem [#allocation8], %s589_s1  ;;  %s431_s14 = scalar_lea.hbm %s1165_s3, %s650_s30 }
  0x2d   : > { %v644_v5 = vld [vmem:[#allocation6 + $0x10] sm:$0xff]  ;;  %v643_v6 = vld [vmem:[#allocation6 + $0x8] sm:$0xff]  ;;  %v642_v7 = vld [vmem:[#allocation6] sm:$0xff]  ;;  %s432_s27 = sshll.u32 %s253_s7, 4  ;;  %s651_s28 = sshll.u32 %s926_s18, 4  ;;  %s1095_s27 = int_to_ptr.vmem [resolvable:$true] %s432_s27 }
  0x2e   : > { %v640_v8 = vld [vmem:[%s225_s11] sm:$0xff]  ;;  %v641_v9 = vld [vmem:[%s225_s11 + $0x8] sm:$0xff]  ;;  %s434_s29 = sshll.u32 %s431_s14, 4  ;;  %s1099_s5 = scalar_lea.vmem [#allocation9], %s587_s13  ;;  %s1107_s29 = int_to_ptr.hbm [resolvable:$true] %s434_s29 }
  0x2f   : > { %v755_v10 = vld [vmem:[%s1164_s2] ss:$0 sm:$0xff]  ;;  %s449_s6 = sshll.u32 %s1099_s5, 4  ;;  %s1105_s11 = scalar_lea.hbm %s1166_s4, %s651_s28  ;;  %s1109_s6 = int_to_ptr.vmem [resolvable:$true] %s449_s6 }
  0x30   : > { %357 = vmatpush.bf16.msra.mxu0 %v648_v1  ;;  %664 = vmatpush.bf16.msra.mxu1 %v648_v1  ;;  %s451_s18 = sshll.u32 %s1105_s11, 4  ;;  %s415_s13 = scalar_lea.sflag [#allocation5], %s1072_s10  ;;  %s452_s18 = int_to_ptr.hbm [resolvable:$true] %s451_s18 }
  0x31   : > { %s830_s1 = sshra.s32 %s1107_s29, 4  ;;  %s836_s8 = scalar_lea.hbm %s1165_s3, 128  ;;  %s831_s1 = int_to_ptr.hbm [resolvable:$true] %s830_s1 }
  0x32   : > { %s832_s23 = scalar_lea.hbm %s831_s1, 32  ;;  %p837_p9 = scmp.lt.s32.totalorder %s831_s1, %s1165_s3 }
  0x33   : > { %p833_p1 = scmp.ne.s32.totalorder %s831_s1, %s832_s23  ;;  %p838_p10 = scmp.lt.s32.totalorder %s836_s8, %s832_s23 }
  0x34   : > { %358 = vmatpush.bf16.msra.mxu0 %v647_v2  ;;  %665 = vmatpush.bf16.msra.mxu1 %v647_v2 }
  0x35   : > { %p834_p4 = pnand %p833_p1, %p1049_p3  ;;  %p839_p11 = por %p838_p10, %p837_p9 }
  0x37   : > { %p835_p8 = pneg %p834_p4 }
  0x38   : > { %359 = vmatpush.bf16.msra.mxu0 %v646_v3  ;;  %666 = vmatpush.bf16.msra.mxu1 %v646_v3 }
  0x39   : > { %p840_p12 = pnand %p839_p11, %p835_p8 }
  0x3c   : > { %360 = vmatpush.bf16.msra.mxu0 %v645_v4  ;;  %667 = vmatpush.bf16.msra.mxu1 %v645_v4 }
  0x40   : > { %361 = vmatpush.bf16.msra.mxu0 %v644_v5  ;;  %668 = vmatpush.bf16.msra.mxu1 %v644_v5 }
  0x44   : > { %362 = vmatpush.bf16.msra.mxu0 %v643_v6  ;;  %669 = vmatpush.bf16.msra.mxu1 %v643_v6 }
  0x48   : > { %363 = vmatpush.bf16.msra.mxu0 %v642_v7  ;;  %670 = vmatpush.bf16.msra.mxu1 %v642_v7 }
  0x4b   : > { %364 = vmatmul.bf16.vlgmr.msra.gmra.mxu0 %v640_v8  ;;  %369 = vmatmul.bf16.vlgmr.msra.gmra.mxu1 %v641_v9 }
  0xc8   : > { %v365_v11 = vpop.f32.mrf.mxu0  ;;  %v370_v12 = vpop.f32.mrf.mxu1 }
  0xc9   : > { %v394_v13 = vadd.f32 %v755_v10, %v365_v11  ;;  %v396_v14 = vadd.f32 %v755_v10, %v370_v12 }
  0xcb   : > { %398 = vst [vmem:[%s253_s7] sm:$0xff] %v394_v13  ;;  %v402_v19 = vmax.f32 %v394_v13, 0.0  ;;  %v404_v20 = vmax.f32 %v396_v14, 0.0 }
  0xcc   : > { %400 = vst [vmem:[%s253_s7 + $0x10] sm:$0xff] %v396_v14 }
  0xd0   : > { %v367_v15 = vpop.f32.mrf.mxu0  ;;  %v372_v16 = vpop.f32.mrf.mxu1 }
  0xd1   : > { %v395_v17 = vadd.f32 %v755_v10, %v367_v15  ;;  %v397_v18 = vadd.f32 %v755_v10, %v372_v16 }
  0xd3   : > { %399 = vst [vmem:[%s253_s7 + $0x8] sm:$0xff] %v395_v17  ;;  %v403_v21 = vmax.f32 %v395_v17, 0.0  ;;  %v405_v22 = vmax.f32 %v397_v18, 0.0 }
  0xd4   : > { %401 = vst [vmem:[%s253_s7 + $0x18] sm:$0xff] %v397_v18 }
  0xd5   : > { %v655_v23 = vpack.c.bf16 %v403_v21, %v402_v19  ;;  %v660_v24 = vpack.c.bf16 %v405_v22, %v404_v20 }
  0xd6   : > { %843 = shalt.err (!%p840_p12)
}
  0xd7   : > { %s939_s7 = smov 128   ;;  %s940_s28 = smov 8   ;;  %656 = vst [vmem:[%s1099_s5] sm:$0xff] %v655_v23  }
  0xd8   : > { %677 = dma.vmem_to_hbm [thread:$0]  (%p1049_p3), %s1095_s27, 512, %s1107_s29, %s415_s13, %s939_s7, %s939_s7, %s940_s28  }
  0xd9   : > { %662 = vst [vmem:[%s1099_s5 + $0x8] sm:$0xff] %v660_v24   ;;  %s420_s24 = scalar_lea.sflag [#allocation10], %s1072_s10  ;;  %s858_s21 = sshra.s32 %s452_s18, 4  ;;  %s859_s21 = int_to_ptr.hbm [resolvable:$true] %s858_s21 }
  0xda   : > { %s860_s11 = scalar_lea.hbm %s859_s21, 16  ;;  %s864_s25 = scalar_lea.hbm %s1166_s4, 64 }
  0xdb   : > { %p861_p13 = scmp.ne.s32.totalorder %s859_s21, %s860_s11  ;;  %p865_p7 = scmp.lt.s32.totalorder %s859_s21, %s1166_s4 }
  0xdc   : > { %p866_p2 = scmp.lt.s32.totalorder %s864_s25, %s860_s11 }
  0xdd   : > { %p862_p0 = pnand %p861_p13, %p1049_p3 }
  0xde   : > { %p867_p1 = por %p866_p2, %p865_p7 }
  0xdf   : > { %p863_p5 = pneg %p862_p0 }
  0xe1   : > { %p868_p4 = pnand %p867_p1, %p863_p5 }
  0xe3   : > { %871 = shalt.err (!%p868_p4)
}
  0xe4   : > { %s941_s10 = smov 64   ;;  %s942_s27 = smov 4  }
  0xe5   : > { %678 = dma.vmem_to_hbm [thread:$0]  (%p1049_p3), %s1109_s6, 256, %s452_s18, %s420_s24, %s941_s10, %s941_s10, %s942_s27  }
  0xe6 PF: > { %p699_p8 = scmp.ge.s32.totalorder %s934_s20, 2  ;;  %s466_s29 = sand.u32 1, %s914_s15  }
  0xe7   : > { %s467_s5 = scalar_lea.sflag [#allocation5], %s466_s29 }
  0xe8   : > { %p690_p9 = pnand %p699_p8, %p1017_p6 }
  0xea   : > { %p691_p10 = pneg %p690_p9 }
  0xec   : > { %905 = dma.done.wait (%p691_p10), %s467_s5, 512  }
  0xed   : > { %907 = vsyncadd (%p691_p10), %s467_s5, 4294966784  ;;  %s477_s13 = scalar_lea.sflag [#allocation10], %s466_s29 }
  0xee   : > { %909 = dma.done.wait (%p691_p10), %s477_s13, 256  }
  0xef   : > { %911 = vsyncadd (%p691_p10), %s477_s13, 4294967040  ;;  %s25_s20 = sadd.s32 1, %s934_s20   ;;  %s1182_s12 = sld [smem:[#allocation15_spill]] }
  0xf0   : > { %p22_p11 = scmp.ge.s32.totalorder %s25_s20, 6   ;;  %s1183_s15 = smov %s918_s16 }
  0xf1   : > { %s1184_s16 = smov %s922_s17  ;;  %s1185_s17 = smov %s1058_s22 }
  0xf2   : > { %s1186_s18 = smov %s930_s19  ;;  %24 = sbr.rel (!%p22_p11) target bundleno = 11 (0xb), region = 106 }
  0xf5   : > { %s1187_s19 = smov %s1182_s12 }
  0xf7   :  { %483 = vsyncpa [#allocation4], 1 }
  0xf8   :  { %485 = vsyncpa [#allocation4 + $0x1], 1 }
  0xf9   :  { %486 = vsyncpa [#allocation7], 1 }
  0xfa   :  { %487 = vsyncpa [#allocation5], 1 }
  0xfb   :  { %489 = vsyncpa [#allocation5 + $0x1], 1 }
  0xfc   :  { %490 = vsyncpa [#allocation10], 1 }
  0xfd   :  { %492 = vsyncpa [#allocation10 + $0x1], 1 }

// kernel: tpu_custom_call.1
= control target key start
LH: loop header
LB: loop body
LE: loop exit
PB: predicated region body
PF: predicated region fallthrough
CT: control target
= control target key end

     0   :  { %s1162_s0 = inlined_call_operand.hbm [shape: bf16[128,128], index: 0, kind: input, shape index: {}]   ;;  %s1163_s1 = inlined_call_operand.hbm [shape: bf16[128,128], index: 1, kind: input, shape index: {}]   ;;  %s1164_s2 = inlined_call_operand.vmem [shape: f32[1,128], index: 2, kind: input, shape index: {}]   ;;  %s1165_s3 = inlined_call_operand.hbm [shape: f32[128,128], index: 3, kind: output, shape index: {0}]   ;;  %s1166_s4 = inlined_call_operand.hbm [shape: bf16[128,128], index: 4, kind: output, shape index: {1}]  }
   0x1   :  { %1170 = sst [smem:[#allocation16_spill]] %s1163_s1 }
   0x2   :  { %10 = vsyncpa [#allocation4], 0 }
   0x3   :  { %12 = vsyncpa [#allocation4 + $0x1], 0 }
   0x4   :  { %13 = vsyncpa [#allocation7], 0 }
   0x5   :  { %14 = vsyncpa [#allocation5], 0 }
   0x6   :  { %16 = vsyncpa [#allocation5 + $0x1], 0 }
   0x7   :  { %17 = vsyncpa [#allocation10], 0 }
   0x8   :  { %19 = vsyncpa [#allocation10 + $0x1], 0  ;;  %s968_s15 = smov 0   ;;  %s970_s16 = smov 0  }
   0x9   :  { %s972_s17 = smov 0   ;;  %s974_s18 = smov 0  }
   0xa   :  { %s976_s19 = smov 0   ;;  %s978_s20 = smov 0  }
   0xb LB: > { %s578_s21 = sadd.s32 4294967295, %s934_s20   ;;  %s579_s22 = sadd.s32 4294967294, %s934_s20   ;;  %s934_s20 = sphi %s978_s20, %s25_s20   ;;  %s930_s19 = sphi %s976_s19, %s1187_s19   ;;  %s926_s18 = sphi %s974_s18, %s1186_s18   ;;  %s922_s17 = sphi %s972_s17, %s1185_s17   ;;  %s918_s16 = sphi %s970_s16, %s1184_s16   ;;  %s914_s15 = sphi %s968_s15, %s1183_s15  }
   0xc   : > { %p59_p0 = scmp.ne.s32.totalorder %s918_s16, %s914_s15  ;;  %p1002_p1 = scmp.eq.s32.totalorder %s578_s21, 0 }
   0xd   : > { %p1006_p2 = scmp.eq.s32.totalorder %s578_s21, 3  ;;  %p131_p3 = scmp.eq.s32.totalorder %s579_s22, 3 }
   0xe   : > { %p1012_p4 = por %p1002_p1, %p59_p0  ;;  %p580_p5 = scmp.ge.s32.totalorder %s934_s20, 1 }
   0xf   : > { %p1017_p6 = por %p131_p3, %p59_p0  ;;  %p164_p7 = scmp.lt.s32.totalorder %s934_s20, 5 }
  0x10   : > { %s1175_s1 = sld [smem:[#allocation16_spill]]  ;;  %s936_s5 = smov [#allocation6]  }
  0x11   : > { %p1025_p8 = pnand %p580_p5, %p164_p7  ;;  %s177_s6 = sshll.u32 %s936_s5, 4  ;;  %s178_s6 = int_to_ptr.vmem [resolvable:$true] %s177_s6 }
  0x12   : > { %s1167_s7 = smov 64   ;;  %s1168_s8 = smov 4  }
  0x13   : > { %p681_p9 = pneg %p1025_p8  ;;  %s37_s9 = sadd.s32 1, %s930_s19 }
  0x14   : > { %p39_p11 = scmp.ge.s32.totalorder %s37_s9, 4  ;;  %s46_s10 = sadd.s32 1, %s922_s17 }
  0x15   : > { %p682_p10 = pnand %p681_p9, %p1002_p1  ;;  %p53_p12 = scmp.ne.s32.totalorder %s922_s17, %s918_s16 }
  0x16   : > { %s175_s29 = sshll.u32 %s1175_s1, 4  ;;  %p54_p13 = scmp.eq.s32.totalorder %s934_s20, 0  ;;  %s176_s29 = int_to_ptr.hbm [resolvable:$true] %s175_s29 }
  0x17   : > { %684 = dma.hbm_to_vmem [thread:$0]  (!%p682_p10), %s176_s29, 1024, %s178_s6, [#allocation7], %s1167_s7, %s1167_s7, %s1168_s8  }
  0x18   : > { %s1189_s9 = smov (%p39_p11, %s37_s9), 0  ;;  %p1043_p0 = por %p54_p13, %p53_p12 }
  0x19   : > { %1177 = sst [smem:[#allocation15_spill]] %s1189_s9  ;;  %p1049_p3 = por %p1006_p2, %p53_p12 }
  0x1a   : > { %s41_s13 = ssub.s32 %s930_s19, %s1189_s9  ;;  %p697_p5 = scmp.lt.s32.totalorder %s934_s20, 4 }
  0x1b   : > { %p44_p7 = scmp.eq.s32.totalorder %s41_s13, 0  ;;  %s194_s14 = sand.u32 1, %s922_s17  }
  0x1c   : > { %s583_s21 = sshll.u32 %s194_s14, 4  ;;  %s639_s27 = sshll.u32 %s930_s19, 4 }
  0x1d   : > { %s1058_s22 = scalar_select %p44_p7, %s922_s17, %s46_s10  }
  0x1e   : > { %s204_s5 = scalar_lea.hbm %s1162_s0, %s639_s27  ;;  %s198_s6 = scalar_lea.vmem [#allocation3], %s583_s21 }
  0x1f   : > { %s207_s7 = sshll.u32 %s198_s6, 4  ;;  %s205_s24 = sshll.u32 %s204_s5, 4  ;;  %s208_s7 = int_to_ptr.vmem [resolvable:$true] %s207_s7  ;;  %s206_s24 = int_to_ptr.hbm [resolvable:$true] %s205_s24 }
  0x20   : > { %p686_p2 = pnand %p697_p5, %p1043_p0  ;;  %s195_s8 = scalar_lea.sflag [#allocation4], %s194_s14 }
  0x21   : > { %s1180_s1 = smov 4   ;;  %s1181_s9 = smov 64  }
  0x22   : > { %688 = dma.hbm_to_vmem [thread:$0]  (!%p686_p2), %s206_s24, 256, %s208_s7, %s195_s8, %s1181_s9, %s1181_s9, %s1180_s1  }
  0x23   : > { %219 = sbr.rel (%p1025_p8) target bundleno = 230 (0xe6), region = 32  ;;  %s1072_s10 = sand.u32 (!%p1025_p8), 1, %s918_s16  }
  0x24   : > { %s587_s13 = sshll.u32 (!%p1025_p8), %s1072_s10, 4  ;;  %s222_s21 = scalar_lea.sflag (!%p1025_p8), [#allocation4], %s1072_s10 }
  0x25   : > { %s225_s11 = scalar_lea.vmem (!%p1025_p8), [#allocation3], %s587_s13 }
  0x28   : > { %897 = dma.done.wait (%p1012_p4), %s222_s21, 256  }
  0x29   : > { %899 = vsyncadd (%p1012_p4), %s222_s21, 4294967040 }
  0x2a   : > { %901 = dma.done.wait (%p1002_p1), [#allocation7], 1024  }
  0x2b   : > { %903 = vsyncadd (%p1002_p1), [#allocation7], 4294966272  ;;  %v649_v0 = vld [vmem:[#allocation6 + $0x38] sm:$0xff]  ;;  %v648_v1 = vld [vmem:[#allocation6 + $0x30] sm:$0xff]  ;;  %s589_s1 = sshll.u32 %s1072_s10, 5  ;;  %s650_s30 = sshll.u32 %s926_s18, 5 }
  0x2c   : > { %356 = vmatpush.bf16.msra.mxu0 %v649_v0  ;;  %663 = vmatpush.bf16.msra.mxu1 %v649_v0  ;;  %v647_v2 = vld [vmem:[#allocation6 + $0x28] sm:$0xff]  ;;  %v646_v3 = vld [vmem:[#allocation6 + $0x20] sm:$0xff]  ;;  %v645_v4 = vld [vmem:[#allocation6 + $0x18] sm:$0xff]  ;;  %s253_s7 = scalar_lea.vmem [#allocation8], %s589_s1  ;;  %s431_s14 = scalar_lea.hbm %s1165_s3, %s650_s30 }
  0x2d   : > { %v644_v5 = vld [vmem:[#allocation6 + $0x10] sm:$0xff]  ;;  %v643_v6 = vld [vmem:[#allocation6 + $0x8] sm:$0xff]  ;;  %v642_v7 = vld [vmem:[#allocation6] sm:$0xff]  ;;  %s432_s27 = sshll.u32 %s253_s7, 4  ;;  %s651_s28 = sshll.u32 %s926_s18, 4  ;;  %s1095_s27 = int_to_ptr.vmem [resolvable:$true] %s432_s27 }
  0x2e   : > { %v640_v8 = vld [vmem:[%s225_s11] sm:$0xff]  ;;  %v641_v9 = vld [vmem:[%s225_s11 + $0x8] sm:$0xff]  ;;  %s434_s29 = sshll.u32 %s431_s14, 4  ;;  %s1099_s5 = scalar_lea.vmem [#allocation9], %s587_s13  ;;  %s1107_s29 = int_to_ptr.hbm [resolvable:$true] %s434_s29 }
  0x2f   : > { %v755_v10 = vld [vmem:[%s1164_s2] ss:$0 sm:$0xff]  ;;  %s449_s6 = sshll.u32 %s1099_s5, 4  ;;  %s1105_s11 = scalar_lea.hbm %s1166_s4, %s651_s28  ;;  %s1109_s6 = int_to_ptr.vmem [resolvable:$true] %s449_s6 }
  0x30   : > { %357 = vmatpush.bf16.msra.mxu0 %v648_v1  ;;  %664 = vmatpush.bf16.msra.mxu1 %v648_v1  ;;  %s451_s18 = sshll.u32 %s1105_s11, 4  ;;  %s415_s13 = scalar_lea.sflag [#allocation5], %s1072_s10  ;;  %s452_s18 = int_to_ptr.hbm [resolvable:$true] %s451_s18 }
  0x31   : > { %s830_s1 = sshra.s32 %s1107_s29, 4  ;;  %s836_s8 = scalar_lea.hbm %s1165_s3, 128  ;;  %s831_s1 = int_to_ptr.hbm [resolvable:$true] %s830_s1 }
  0x32   : > { %s832_s23 = scalar_lea.hbm %s831_s1, 32  ;;  %p837_p9 = scmp.lt.s32.totalorder %s831_s1, %s1165_s3 }
  0x33   : > { %p833_p1 = scmp.ne.s32.totalorder %s831_s1, %s832_s23  ;;  %p838_p10 = scmp.lt.s32.totalorder %s836_s8, %s832_s23 }
  0x34   : > { %358 = vmatpush.bf16.msra.mxu0 %v647_v2  ;;  %665 = vmatpush.bf16.msra.mxu1 %v647_v2 }
  0x35   : > { %p834_p4 = pnand %p833_p1, %p1049_p3  ;;  %p839_p11 = por %p838_p10, %p837_p9 }
  0x37   : > { %p835_p8 = pneg %p834_p4 }
  0x38   : > { %359 = vmatpush.bf16.msra.mxu0 %v646_v3  ;;  %666 = vmatpush.bf16.msra.mxu1 %v646_v3 }
  0x39   : > { %p840_p12 = pnand %p839_p11, %p835_p8 }
  0x3c   : > { %360 = vmatpush.bf16.msra.mxu0 %v645_v4  ;;  %667 = vmatpush.bf16.msra.mxu1 %v645_v4 }
  0x40   : > { %361 = vmatpush.bf16.msra.mxu0 %v644_v5  ;;  %668 = vmatpush.bf16.msra.mxu1 %v644_v5 }
  0x44   : > { %362 = vmatpush.bf16.msra.mxu0 %v643_v6  ;;  %669 = vmatpush.bf16.msra.mxu1 %v643_v6 }
  0x48   : > { %363 = vmatpush.bf16.msra.mxu0 %v642_v7  ;;  %670 = vmatpush.bf16.msra.mxu1 %v642_v7 }
  0x4b   : > { %364 = vmatmul.bf16.vlgmr.msra.gmra.mxu0 %v640_v8  ;;  %369 = vmatmul.bf16.vlgmr.msra.gmra.mxu1 %v641_v9 }
  0xc8   : > { %v365_v11 = vpop.f32.mrf.mxu0  ;;  %v370_v12 = vpop.f32.mrf.mxu1 }
  0xc9   : > { %v394_v13 = vadd.f32 %v755_v10, %v365_v11  ;;  %v396_v14 = vadd.f32 %v755_v10, %v370_v12 }
  0xcb   : > { %398 = vst [vmem:[%s253_s7] sm:$0xff] %v394_v13  ;;  %v402_v19 = vmax.f32 %v394_v13, 0.0  ;;  %v404_v20 = vmax.f32 %v396_v14, 0.0 }
  0xcc   : > { %400 = vst [vmem:[%s253_s7 + $0x10] sm:$0xff] %v396_v14 }
  0xd0   : > { %v367_v15 = vpop.f32.mrf.mxu0  ;;  %v372_v16 = vpop.f32.mrf.mxu1 }
  0xd1   : > { %v395_v17 = vadd.f32 %v755_v10, %v367_v15  ;;  %v397_v18 = vadd.f32 %v755_v10, %v372_v16 }
  0xd3   : > { %399 = vst [vmem:[%s253_s7 + $0x8] sm:$0xff] %v395_v17  ;;  %v403_v21 = vmax.f32 %v395_v17, 0.0  ;;  %v405_v22 = vmax.f32 %v397_v18, 0.0 }
  0xd4   : > { %401 = vst [vmem:[%s253_s7 + $0x18] sm:$0xff] %v397_v18 }
  0xd5   : > { %v655_v23 = vpack.c.bf16 %v403_v21, %v402_v19  ;;  %v660_v24 = vpack.c.bf16 %v405_v22, %v404_v20 }
  0xd6   : > { %843 = shalt.err (!%p840_p12)
}
  0xd7   : > { %s939_s7 = smov 128   ;;  %s940_s28 = smov 8   ;;  %656 = vst [vmem:[%s1099_s5] sm:$0xff] %v655_v23  }
  0xd8   : > { %677 = dma.vmem_to_hbm [thread:$0]  (%p1049_p3), %s1095_s27, 512, %s1107_s29, %s415_s13, %s939_s7, %s939_s7, %s940_s28  }
  0xd9   : > { %662 = vst [vmem:[%s1099_s5 + $0x8] sm:$0xff] %v660_v24   ;;  %s420_s24 = scalar_lea.sflag [#allocation10], %s1072_s10  ;;  %s858_s21 = sshra.s32 %s452_s18, 4  ;;  %s859_s21 = int_to_ptr.hbm [resolvable:$true] %s858_s21 }
  0xda   : > { %s860_s11 = scalar_lea.hbm %s859_s21, 16  ;;  %s864_s25 = scalar_lea.hbm %s1166_s4, 64 }
  0xdb   : > { %p861_p13 = scmp.ne.s32.totalorder %s859_s21, %s860_s11  ;;  %p865_p7 = scmp.lt.s32.totalorder %s859_s21, %s1166_s4 }
  0xdc   : > { %p866_p2 = scmp.lt.s32.totalorder %s864_s25, %s860_s11 }
  0xdd   : > { %p862_p0 = pnand %p861_p13, %p1049_p3 }
  0xde   : > { %p867_p1 = por %p866_p2, %p865_p7 }
  0xdf   : > { %p863_p5 = pneg %p862_p0 }
  0xe1   : > { %p868_p4 = pnand %p867_p1, %p863_p5 }
  0xe3   : > { %871 = shalt.err (!%p868_p4)
}
  0xe4   : > { %s941_s10 = smov 64   ;;  %s942_s27 = smov 4  }
  0xe5   : > { %678 = dma.vmem_to_hbm [thread:$0]  (%p1049_p3), %s1109_s6, 256, %s452_s18, %s420_s24, %s941_s10, %s941_s10, %s942_s27  }
  0xe6 PF: > { %p699_p8 = scmp.ge.s32.totalorder %s934_s20, 2  ;;  %s466_s29 = sand.u32 1, %s914_s15  }
  0xe7   : > { %s467_s5 = scalar_lea.sflag [#allocation5], %s466_s29 }
  0xe8   : > { %p690_p9 = pnand %p699_p8, %p1017_p6 }
  0xea   : > { %p691_p10 = pneg %p690_p9 }
  0xec   : > { %905 = dma.done.wait (%p691_p10), %s467_s5, 512  }
  0xed   : > { %907 = vsyncadd (%p691_p10), %s467_s5, 4294966784  ;;  %s477_s13 = scalar_lea.sflag [#allocation10], %s466_s29 }
  0xee   : > { %909 = dma.done.wait (%p691_p10), %s477_s13, 256  }
  0xef   : > { %911 = vsyncadd (%p691_p10), %s477_s13, 4294967040  ;;  %s25_s20 = sadd.s32 1, %s934_s20   ;;  %s1182_s12 = sld [smem:[#allocation15_spill]] }
  0xf0   : > { %p22_p11 = scmp.ge.s32.totalorder %s25_s20, 6   ;;  %s1183_s15 = smov %s918_s16 }
  0xf1   : > { %s1184_s16 = smov %s922_s17  ;;  %s1185_s17 = smov %s1058_s22 }
  0xf2   : > { %s1186_s18 = smov %s930_s19  ;;  %24 = sbr.rel (!%p22_p11) target bundleno = 11 (0xb), region = 106 }
  0xf5   : > { %s1187_s19 = smov %s1182_s12 }
  0xf7   :  { %483 = vsyncpa [#allocation4], 1 }
  0xf8   :  { %485 = vsyncpa [#allocation4 + $0x1], 1 }
  0xf9   :  { %486 = vsyncpa [#allocation7], 1 }
  0xfa   :  { %487 = vsyncpa [#allocation5], 1 }
  0xfb   :  { %489 = vsyncpa [#allocation5 + $0x1], 1 }
  0xfc   :  { %490 = vsyncpa [#allocation10], 1 }
  0xfd   :  { %492 = vsyncpa [#allocation10 + $0x1], 1 }

</bundles_post_ra>
